<compile_context>
chip_gen: v5e
topology: v5e:2x2
jax: 0.10.0
libtpu: 0.0.40
codegen_flags: <defaults>
</compile_context>

<pallas_src>
import jax
import jax.numpy as jnp
from jax.experimental import pallas as pl
from jax.experimental.pallas import tpu as pltpu


# ---------------------------------------------------------------------------
# Kernel factory
# ---------------------------------------------------------------------------

def _make_kernel(*, steps, tile_r, r_total, need_row_mask, masked):
    """Builds the accumulation kernel.

    Accumulates per-lane sums of (masked) routing weights into a resident
    (8, L) f32 output block (one block per token split)."""

    def _apply_row_mask(x):
        if not need_row_mask:
            return x
        # Logical (unclamped) block index -> number of valid rows in this block.
        blk = pl.program_id(0) * steps + pl.program_id(1)
        valid = r_total - blk * tile_r            # may be <= 0 for dead blocks
        rows = jax.lax.broadcasted_iota(jnp.int32, (tile_r, 1), 0)
        # where() so garbage (even NaN/Inf) in OOB rows never propagates.
        return jnp.where(rows < valid, x, 0.0)

    if masked:
        def kernel(rw_ref, mask_ref, p_ref, out_ref):
            @pl.when(pl.program_id(1) == 0)
            def _():
                out_ref[...] = jnp.zeros_like(out_ref)

            m = mask_ref[...].astype(jnp.bfloat16)            # [tile_r, G]
            # Lane expansion exp[r, g*E + e] = m[r, g] via a 0/1 bf16 matmul
            # on the otherwise idle MXU (exact for 0/1 values).
            exp_mask = jnp.dot(m, p_ref[...],
                               preferred_element_type=jnp.float32)  # [tile_r, L]
            x = rw_ref[...].astype(jnp.float32) * exp_mask
            x = _apply_row_mask(x)
            # Layout-free sublane split -> pure VALU vreg adds into the full
            # (8, L) resident block (final 8-row collapse happens in wrapper).
            out_ref[...] += jnp.sum(
                x.reshape(tile_r // 8, 8, x.shape[-1]), axis=0)
        return kernel

    def kernel(rw_ref, out_ref):
        @pl.when(pl.program_id(1) == 0)
        def _():
            out_ref[...] = jnp.zeros_like(out_ref)

        x = _apply_row_mask(rw_ref[...].astype(jnp.float32))
        out_ref[...] += jnp.sum(x.reshape(tile_r // 8, 8, x.shape[-1]), axis=0)
    return kernel


# ---------------------------------------------------------------------------
# VMEM planning
# ---------------------------------------------------------------------------

def _vmem_plan():
    """Returns (tile budget bytes, vmem_limit_bytes), generation-aware."""
    try:
        cap = getattr(pltpu.get_tpu_info(), "vmem_capacity_bytes",
                      64 * 1024 * 1024)
    except Exception:  # not on TPU / API mismatch -> conservative
        cap = 64 * 1024 * 1024
    if cap >= 96 * 1024 * 1024:
        # v5e / v6e: 128 MiB physical VMEM -> big tiles, 64 MiB scoped limit.
        return 56 * 1024 * 1024, 64 * 1024 * 1024
    # v7x: 64 MiB physical VMEM per TensorCore -> stay well under.
    return 26 * 1024 * 1024, 44 * 1024 * 1024


def _pick_tile_rows(R, L, rw_itemsize, G, mask_itemsize, max_rows, budget):
    """Largest row tile (multiple of 8) whose double-buffered inputs PLUS the
    in-kernel f32 intermediates fit the budget.  No divisibility requirement;
    ragged last blocks are masked in-kernel."""
    r_cap = -(-R // 8) * 8  # R rounded up to a multiple of 8
    tile = 8
    for cand in (2048, 1024, 512, 256, 128, 64, 32, 16, 8):
        if cand > max_rows:
            continue
        # in-kernel f32 temporaries: rw cast (+ materialized exp_mask if masked)
        f32_interm = (2 if mask_itemsize else 1) * cand * L * 4
        vmem = (2 * cand * L * rw_itemsize          # rw double buffer
                + 2 * cand * G * mask_itemsize      # mask double buffer
                + 2 * G * L * 2                     # bf16 expansion matrix P
                + 2 * 8 * L * 4                     # output block
                + f32_interm)
        if vmem <= budget:
            tile = cand
            break
    return min(tile, r_cap)


# ---------------------------------------------------------------------------
# Wrapper
# ---------------------------------------------------------------------------

def load_balancing_loss(routing_weights, attention_mask=None,
                        num_experts=12, eps=1e-8, max_tile_rows=2048):
    """routing_weights: [B, S, E]; attention_mask: optional [B, S]."""
    B, S, E = routing_weights.shape
    N = B * S

    G = 128               # tokens folded into the lane dim per grouped row
    L = G * E             # lane width of the streamed slab (multiple of 128)

    rw_flat = routing_weights.reshape(N, E)          # free reshape, native dtype
    has_mask = attention_mask is not None
    if has_mask:
        mask_flat = attention_mask.reshape(N)
        if not jnp.issubdtype(mask_flat.dtype, jnp.floating):
            # bool / int mask -> bf16 once (0/1 exact); float masks stream
            # natively and are cast to bf16 in-kernel (avoids a wrapper copy).
            mask_flat = mask_flat.astype(jnp.bfloat16)

    R = N // G
    n_main = R * G
    tail_sums = None                                  # [E] f32 or None

    if R == 0:
        # Tiny input: pad to one grouped row (<= 127 rows of E values: trivial).
        rw_main = jnp.pad(rw_flat, ((0, G - N), (0, 0)))
        mask_main = jnp.pad(mask_flat, (0, G - N)) if has_mask else None
        R, n_main = 1, G
    elif n_main == N:
        # Aligned: completely copy-free reshape into the lane-dense slab.
        rw_main = rw_flat
        mask_main = mask_flat if has_mask else None
    else:
        # Unaligned: kernel consumes the aligned prefix; the <128-token tail is
        # reduced in plain JAX (tiny).
        rw_main = rw_flat[:n_main]
        mask_main = mask_flat[:n_main] if has_mask else None
        tail = rw_flat[n_main:].astype(jnp.float32)
        if has_mask:
            tail = tail * mask_flat[n_main:].astype(jnp.float32)[:, None]
        tail_sums = jnp.sum(tail, axis=0)            # [E]

    rw2 = rw_main.reshape(R, L)                      # [R, G*E], lane-dense
    mask2 = mask_main.reshape(R, G) if has_mask else None

    budget, vmem_limit = _vmem_plan()
    tile_r = _pick_tile_rows(
        R, L, rw2.dtype.itemsize, G,
        mask2.dtype.itemsize if has_mask else 0,
        max_tile_rows, budget)

    r_tiles = -(-R // tile_r)
    # 2-way token split always engages when possible (both TensorCores on v7x;
    # a harmless serial outer loop of 2 on single-TC chips).
    num_splits = 2 if r_tiles >= 2 else 1
    steps = -(-r_tiles // num_splits)
    # Any partial / dead block is zeroed in-kernel with a static-row-count mask.
    need_row_mask = (num_splits * steps * tile_r) != R
    last_blk = r_tiles - 1

    def block_index(c, j):
        blk = c * steps + j
        # Clamp dead overshoot blocks onto the last real block (their
        # contribution is zeroed by the in-kernel row mask).
        return (jnp.minimum(blk, last_blk), 0)

    kernel = _make_kernel(steps=steps, tile_r=tile_r, r_total=R,
                          need_row_mask=need_row_mask, masked=has_mask)

    rw_spec = pl.BlockSpec((tile_r, L), block_index)
    out_spec = pl.BlockSpec((8, L), lambda c, j: (c, 0))
    out_shape = jax.ShapeDtypeStruct((num_splits * 8, L), jnp.float32)

    cparams = pltpu.CompilerParams(
        dimension_semantics=("parallel", "arbitrary"),
        vmem_limit_bytes=vmem_limit,
    )

    if has_mask:
        # Constant 0/1 lane-expansion matrix in bf16: P[g, g*E + e] = 1.
        lane_group = jnp.arange(L, dtype=jnp.int32) // E
        p_mat = (lane_group[None, :]
                 == jnp.arange(G, dtype=jnp.int32)[:, None]).astype(jnp.bfloat16)
        in_specs = [rw_spec,
                    pl.BlockSpec((tile_r, G), block_index),
                    # Constant index map -> Pallas fetches P once and keeps it
                    # resident across the whole grid.
                    pl.BlockSpec((G, L), lambda c, j: (0, 0))]
        args = (rw2, mask2, p_mat)
    else:
        in_specs = [rw_spec]
        args = (rw2,)

    out = pl.pallas_call(
        kernel,
        out_shape=out_shape,
        grid_spec=pltpu.PrefetchScalarGridSpec(
            num_scalar_prefetch=0,
            grid=(num_splits, steps),
            in_specs=in_specs,
            out_specs=out_spec,
        ),
        compiler_params=cparams,
    )(*args)

    # Tiny finalize in plain JAX.
    per_lane = jnp.sum(out, axis=0)                       # [L]
    s = jnp.sum(per_lane.reshape(G, E), axis=0)           # [E] per-expert sums
    if tail_sums is not None:
        s = s + tail_sums
    total = jnp.sum(s)
    routing_probs = s / jnp.float32(N)                    # mean over ORIGINAL N
    tokens_per_expert = s / (total + jnp.float32(eps))
    return jnp.float32(num_experts) * jnp.sum(routing_probs * tokens_per_expert)


# ---------------------------------------------------------------------------
# Reference + test
# ---------------------------------------------------------------------------

def _reference(routing_weights, attention_mask, num_experts, eps):
    rw = routing_weights.astype(jnp.float32)
    if attention_mask is not None:
        rw = rw * attention_mask.astype(jnp.float32)[..., None]
    routing_probs = rw.mean(axis=(0, 1))
    tokens_per_expert = rw.sum(axis=(0, 1)) / (rw.sum() + eps)
    return num_experts * jnp.sum(routing_probs * tokens_per_expert)


if __name__ == "__main__":
    num_experts = 12
    eps = 1e-8

    key = jax.random.PRNGKey(0)
    keys = jax.random.split(key, 6)

    # --- small shape: B=2, S=8 (module's intended usage; N < 128 path) -------
    B, S = 2, 8
    logits = jax.random.normal(keys[0], (B, S, num_experts), dtype=jnp.float32)
    rw_small = jax.nn.softmax(logits, axis=-1)
    mask_small = (jax.random.uniform(keys[1], (B, S)) > 0.2).astype(jnp.float32)

    out = jax.block_until_ready(
        load_balancing_loss(rw_small, mask_small,
                            num_experts=num_experts, eps=eps))
    ref = _reference(rw_small, mask_small, num_experts, eps)
    assert jnp.allclose(out, ref, rtol=1e-5, atol=1e-6), (out, ref)

    out = jax.block_until_ready(
        load_balancing_loss(rw_small, None, num_experts=num_experts, eps=eps))
    ref = _reference(rw_small, None, num_experts, eps)
    assert jnp.allclose(out, ref, rtol=1e-5, atol=1e-6), (out, ref)

    # --- aligned N, multi-tile / 2-way-split path (small tiles forced) -------
    B2, S2 = 2, 2048
    rw_big = jax.nn.softmax(
        jax.random.normal(keys[2], (B2, S2, num_experts), jnp.float32), axis=-1)
    mask_big = (jax.random.uniform(keys[3], (B2, S2)) > 0.3).astype(jnp.float32)

    out = jax.block_until_ready(
        load_balancing_loss(rw_big, mask_big, num_experts=num_experts,
                            eps=eps, max_tile_rows=8))
    ref = _reference(rw_big, mask_big, num_experts, eps)
    assert jnp.allclose(out, ref, rtol=1e-5, atol=1e-5), (out, ref)

    out = jax.block_until_ready(
        load_balancing_loss(rw_big, None, num_experts=num_experts, eps=eps))
    ref = _reference(rw_big, None, num_experts, eps)
    assert jnp.allclose(out, ref, rtol=1e-5, atol=1e-5), (out, ref)

    # --- unaligned N: ragged last block, JAX tail, clamped dead block --------
    B3, S3 = 3, 1000
    rw_odd = jax.nn.softmax(
        jax.random.normal(keys[4], (B3, S3, num_experts), jnp.float32), axis=-1)
    mask_odd = (jax.random.uniform(keys[5], (B3, S3)) > 0.25).astype(jnp.float32)

    out = jax.block_until_ready(
        load_balancing_loss(rw_odd, mask_odd, num_experts=num_experts,
                            eps=eps, max_tile_rows=8))
    ref = _reference(rw_odd, mask_odd, num_experts, eps)
    assert jnp.allclose(out, ref, rtol=1e-5, atol=1e-5), (out, ref)

    out = jax.block_until_ready(
        load_balancing_loss(rw_odd, None, num_experts=num_experts, eps=eps))
    ref = _reference(rw_odd, None, num_experts, eps)
    assert jnp.allclose(out, ref, rtol=1e-5, atol=1e-5), (out, ref)

    print("KERNEL_OK")
</pallas_src>

<mosaic_0001>
module attributes {stable_mosaic.version = 11 : i64} {
  func.func @kernel(%arg0: i32, %arg1: i32, %arg2: memref<8x1536xf32, #tpu.memory_space<vmem>>, %arg3: memref<8x128xf32, #tpu.memory_space<vmem>>, %arg4: memref<128x1536xbf16, #tpu.memory_space<vmem>>, %arg5: memref<8x1536xf32, #tpu.memory_space<vmem>>) attributes {dimension_semantics = [#tpu.dimension_semantics<parallel>, #tpu.dimension_semantics<arbitrary>], iteration_bounds = array<i64: 1, 1>, scalar_prefetch = 0 : i64, scratch_operands = 0 : i64, tpu.core_type = #tpu.core_type<tc>, window_params = [{transform_indices = @transform_0, window_bounds = array<i64: 8, 1536>}, {transform_indices = @transform_1, window_bounds = array<i64: 8, 128>}, {pipeline_mode = #tpu.pipeline_mode<synchronous>, transform_indices = @transform_2, window_bounds = array<i64: 128, 1536>}, {transform_indices = @transform_3, window_bounds = array<i64: 8, 1536>}]} {
    %c0_i32 = arith.constant 0 : i32
    %0 = arith.cmpi eq, %arg1, %c0_i32 : i32
    %1 = arith.extui %0 : i1 to i32
    %c0_i32_0 = arith.constant 0 : i32
    %2 = arith.cmpi ne, %1, %c0_i32_0 : i32
    scf.if %2 {
      %cst_13 = arith.constant 0.000000e+00 : f32
      %25 = vector.broadcast %cst_13 : f32 to vector<8x1536xf32>
      %c0_14 = arith.constant 0 : index
      %c0_15 = arith.constant 0 : index
      %26 = vector.load %arg5[%c0_14, %c0_15] : memref<8x1536xf32, #tpu.memory_space<vmem>>, vector<8x1536xf32>
      tpu.vector_store %arg5[%c0_14, %c0_15], %25 {strides = array<i32>} : memref<8x1536xf32, #tpu.memory_space<vmem>>, vector<8x1536xf32>,
    } else {
    }
    %c0 = arith.constant 0 : index
    %c0_1 = arith.constant 0 : index
    %3 = vector.load %arg3[%c0, %c0_1] : memref<8x128xf32, #tpu.memory_space<vmem>>, vector<8x128xf32>
    %4 = arith.truncf %3 : vector<8x128xf32> to vector<8x128xbf16>
    %c0_2 = arith.constant 0 : index
    %c0_3 = arith.constant 0 : index
    %5 = vector.load %arg4[%c0_2, %c0_3] : memref<128x1536xbf16, #tpu.memory_space<vmem>>, vector<128x1536xbf16>
    %cst = arith.constant dense<0.000000e+00> : vector<8x1536xf32>
    %6 = tpu.matmul %4, %5, %cst {dimension_numbers = #tpu.dot_dimension_numbers<[1], [0], [0], [1], [0, 0, 1, 1], [], []>} : vector<8x128xbf16>, vector<128x1536xbf16>, vector<8x1536xf32> -> vector<8x1536xf32>
    %c0_4 = arith.constant 0 : index
    %c0_5 = arith.constant 0 : index
    %7 = vector.load %arg2[%c0_4, %c0_5] : memref<8x1536xf32, #tpu.memory_space<vmem>>, vector<8x1536xf32>
    %8 = arith.mulf %7, %6 : vector<8x1536xf32>
    %c1_i32 = arith.constant 1 : i32
    %9 = arith.muli %arg0, %c1_i32 : i32
    %10 = arith.addi %9, %arg1 : i32
    %c8_i32 = arith.constant 8 : i32
    %11 = arith.muli %10, %c8_i32 : i32
    %c1_i32_6 = arith.constant 1 : i32
    %12 = arith.subi %c1_i32_6, %11 : i32
    %13 = tpu.iota {dimensions = array<i32: 0>} : vector<8x1xi32>
    %14 = vector.broadcast %12 : i32 to vector<8x1xi32>
    %15 = arith.cmpi slt, %13, %14 : vector<8x1xi32>
    %cst_7 = arith.constant 0.000000e+00 : f32
    %16 = vector.shape_cast %15 : vector<8x1xi1> to vector<8x1xi1>
    %17 = vector.broadcast %16 : vector<8x1xi1> to vector<8x1536xi1>
    %18 = vector.broadcast %cst_7 : f32 to vector<8x1536xf32>
    %19 = arith.select %17, %8, %18 : vector<8x1536xi1>, vector<8x1536xf32>
    %c0_8 = arith.constant 0 : index
    %c0_9 = arith.constant 0 : index
    %20 = vector.load %arg5[%c0_8, %c0_9] : memref<8x1536xf32, #tpu.memory_space<vmem>>, vector<8x1536xf32>
    %21 = vector.shape_cast %19 : vector<8x1536xf32> to vector<1x8x1536xf32>
    %cst_10 = arith.constant dense<0.000000e+00> : vector<8x1536xf32>
    %22 = vector.multi_reduction <add>, %21, %cst_10 [0] : vector<1x8x1536xf32> to vector<8x1536xf32>
    %23 = arith.addf %20, %22 : vector<8x1536xf32>
    %c0_11 = arith.constant 0 : index
    %c0_12 = arith.constant 0 : index
    %24 = vector.load %arg5[%c0_11, %c0_12] : memref<8x1536xf32, #tpu.memory_space<vmem>>, vector<8x1536xf32>
    tpu.vector_store %arg5[%c0_11, %c0_12], %23 {strides = array<i32>} : memref<8x1536xf32, #tpu.memory_space<vmem>>, vector<8x1536xf32>,
    return
  }
  func.func @transform_0(%arg0: i32, %arg1: i32) -> (i32, i32) {
    %c1_i32 = arith.constant 1 : i32
    %0 = arith.muli %arg0, %c1_i32 : i32
    %1 = arith.addi %0, %arg1 : i32
    %c0_i32 = arith.constant 0 : i32
    %2 = arith.minsi %1, %c0_i32 : i32
    %c0_i32_0 = arith.constant 0 : i32
    %c0_i32_1 = arith.constant 0 : i32
    return %2, %c0_i32_0 : i32, i32
  }
  func.func @transform_1(%arg0: i32, %arg1: i32) -> (i32, i32) {
    %c1_i32 = arith.constant 1 : i32
    %0 = arith.muli %arg0, %c1_i32 : i32
    %1 = arith.addi %0, %arg1 : i32
    %c0_i32 = arith.constant 0 : i32
    %2 = arith.minsi %1, %c0_i32 : i32
    %c0_i32_0 = arith.constant 0 : i32
    %c0_i32_1 = arith.constant 0 : i32
    return %2, %c0_i32_0 : i32, i32
  }
  func.func @transform_2(%arg0: i32, %arg1: i32) -> (i32, i32) {
    %c0_i32 = arith.constant 0 : i32
    %c0_i32_0 = arith.constant 0 : i32
    %c0_i32_1 = arith.constant 0 : i32
    return %c0_i32, %c0_i32_0 : i32, i32
  }
  func.func @transform_3(%arg0: i32, %arg1: i32) -> (i32, i32) {
    %c0_i32 = arith.constant 0 : i32
    %c0_i32_0 = arith.constant 0 : i32
    return %arg0, %c0_i32 : i32, i32
  }
}

</mosaic_0001>

<bundles_post_ra>
// kernel: tpu_custom_call.1
= control target key start
LH: loop header
LB: loop body
LE: loop exit
PB: predicated region body
PF: predicated region fallthrough
CT: control target
= control target key end

     0   :  { %8 = vsyncpa [#allocation3], 0  ;;  %s1936_s0 = inlined_call_operand.hbm [shape: f32[1,1536], index: 0, kind: input, shape index: {}]   ;;  %s1937_s1 = inlined_call_operand.hbm [shape: f32[1,128], index: 1, kind: input, shape index: {}]   ;;  %s1938_s2 = inlined_call_operand.hbm [shape: bf16[128,1536], index: 2, kind: input, shape index: {}]   ;;  %s1939_s3 = inlined_call_operand.hbm [shape: f32[8,1536], index: 3, kind: output, shape index: {}]  }
   0x1   :  { %9 = vsyncpa [#allocation6], 0 }
   0x2   :  { %10 = vsyncpa [#allocation4], 0 }
   0x3   :  { %21 = vsyncadd [#allocation3], 1344  ;;  %s26_s14 = sshll.u32 %s1936_s0, 4  ;;  %s1773_s15 = smov [#allocation2]   ;;  %s27_s14 = int_to_ptr.hbm [resolvable:$true] %s26_s14 }
   0x4   :  { %s28_s16 = sshll.u32 %s1773_s15, 4  ;;  %s1774_s17 = smov 192   ;;  %s29_s16 = int_to_ptr.vmem [resolvable:$true] %s28_s16 }
   0x5   :  { %s1775_s18 = smov 12  }
   0x6   :  { %34 = dma.hbm_to_vmem [thread:$0]  %s27_s14, 192, %s29_s16, [#allocation3], %s1774_s17, %s1774_s17, %s1775_s18  }
   0x7   :  { %44 = vsyncadd [#allocation6], 112  ;;  %s47_s21 = sshll.u32 %s1937_s1, 4  ;;  %s1776_s22 = smov [#allocation5]   ;;  %s48_s21 = int_to_ptr.hbm [resolvable:$true] %s47_s21 }
   0x8   :  { %s49_s23 = sshll.u32 %s1776_s22, 4  ;;  %s60_s0 = sshll.u32 %s1938_s2, 4  ;;  %s50_s23 = int_to_ptr.vmem [resolvable:$true] %s49_s23  ;;  %s61_s0 = int_to_ptr.hbm [resolvable:$true] %s60_s0 }
   0x9   :  { %s1777_s26 = smov 16   ;;  %s1778_s27 = smov 1  }
   0xa   :  { %55 = dma.hbm_to_vmem [thread:$0]  %s48_s21, 16, %s50_s23, [#allocation6], %s1777_s26, %s1777_s26, %s1778_s27  }
   0xb   :  { %s1779_s28 = smov [#allocation7]   ;;  %s1780_s30 = smov 768  }
   0xc   :  { %s62_s29 = sshll.u32 %s1779_s28, 4  ;;  %s1781_s4 = smov 48   ;;  %s63_s29 = int_to_ptr.vmem [resolvable:$true] %s62_s29 }
   0xd   :  { %68 = dma.hbm_to_vmem [thread:$0]  %s61_s0, 12288, %s63_s29, [#allocation6], %s1780_s30, %s1780_s30, %s1781_s4  }
   0xe   :  { %1767 = dma.done.wait [#allocation3], 1536  }
   0xf   :  { %1768 = vsyncadd [#allocation3], 4294965760 }
  0x10   :  { %1769 = dma.done.wait [#allocation6], 12416  }
  0x11   :  { %1770 = vsyncadd [#allocation6], 4294954880  ;;  %v1518_v0 = vld [vmem:[#allocation7 + $0x2a0] sm:$0xf]  ;;  %v1654_v1 = vld [vmem:[#allocation7 + $0x2cc] sm:$0xf0] }
  0x12   :  { %v1648_v2 = vld [vmem:[#allocation7 + $0x2a4] sm:$0xf]  ;;  %v1519_v3 = vor.u32 %v1654_v1, %v1518_v0  ;;  %v1520_v4 = vld [vmem:[#allocation7 + $0x2d0] sm:$0xf0]  ;;  %v1526_v5 = vld [vmem:[#allocation7 + $0x2a8] sm:$0xf] }
  0x13   :  { %v1655_v6 = vld [vmem:[#allocation7 + $0x2d4] sm:$0xf0]  ;;  %v1523_v7 = vor.u32 %v1648_v2, %v1520_v4  ;;  %v1649_v9 = vld [vmem:[#allocation7 + $0x2ac] sm:$0xf]  ;;  %v1528_v10 = vld [vmem:[#allocation7 + $0x2d8] sm:$0xf0] }
  0x14   :  { %v1527_v8 = vor.u32 %v1655_v6, %v1526_v5  ;;  %v1470_v11 = vld [vmem:[#allocation7 + $0x240] sm:$0xf]  ;;  %686 = vmatpush.bf16.msra.mxu0 %v1519_v3  ;;  %v1531_v12 = vor.u32 %v1649_v9, %v1528_v10  ;;  %v1642_v13 = vld [vmem:[#allocation7 + $0x26c] sm:$0xf0]  ;;  %v1636_v14 = vld [vmem:[#allocation7 + $0x244] sm:$0xf] }
  0x15   :  { %v1472_v15 = vld [vmem:[#allocation7 + $0x270] sm:$0xf0]  ;;  %699 = vmatpush.bf16.msra.mxu1 %v1523_v7  ;;  %v1471_v16 = vor.u32 %v1642_v13, %v1470_v11  ;;  %v1478_v18 = vld [vmem:[#allocation7 + $0x248] sm:$0xf]  ;;  %v1643_v19 = vld [vmem:[#allocation7 + $0x274] sm:$0xf0] }
  0x16   :  { %712 = vmatpush.bf16.msra.mxu2 %v1527_v8  ;;  %v1475_v17 = vor.u32 %v1636_v14, %v1472_v15  ;;  %v1637_v20 = vld [vmem:[#allocation7 + $0x24c] sm:$0xf]  ;;  %725 = vmatpush.bf16.msra.mxu3 %v1531_v12  ;;  %v1479_v21 = vor.u32 %v1643_v19, %v1478_v18  ;;  %v1480_v22 = vld [vmem:[#allocation7 + $0x278] sm:$0xf0]  ;;  %v1422_v23 = vld [vmem:[#allocation7 + $0x1e0] sm:$0xf] }
  0x17   :  { %v1630_v24 = vld [vmem:[#allocation7 + $0x20c] sm:$0xf0]  ;;  %v1483_v25 = vor.u32 %v1637_v20, %v1480_v22  ;;  %v1624_v26 = vld [vmem:[#allocation7 + $0x1e4] sm:$0xf]  ;;  %v1424_v27 = vld [vmem:[#allocation7 + $0x210] sm:$0xf0] }
  0x18   :  { %v1430_v28 = vld [vmem:[#allocation7 + $0x1e8] sm:$0xf]  ;;  %687 = vmatpush.bf16.msra.mxu0 %v1471_v16  ;;  %v1423_v29 = vor.u32 %v1630_v24, %v1422_v23  ;;  %v1631_v30 = vld [vmem:[#allocation7 + $0x214] sm:$0xf0]  ;;  %v1625_v31 = vld [vmem:[#allocation7 + $0x1ec] sm:$0xf]  ;;  %v1427_v33 = vor.u32 %v1624_v26, %v1424_v27 }
  0x19   :  { %v1432_v32 = vld [vmem:[#allocation7 + $0x218] sm:$0xf0]  ;;  %700 = vmatpush.bf16.msra.mxu1 %v1475_v17  ;;  %v1431_v34 = vor.u32 %v1631_v30, %v1430_v28  ;;  %v1374_v35 = vld [vmem:[#allocation7 + $0x180] sm:$0xf]  ;;  %v1618_v36 = vld [vmem:[#allocation7 + $0x1ac] sm:$0xf0] }
  0x1a   :  { %713 = vmatpush.bf16.msra.mxu2 %v1479_v21  ;;  %v1612_v37 = vld [vmem:[#allocation7 + $0x184] sm:$0xf]  ;;  %726 = vmatpush.bf16.msra.mxu3 %v1483_v25  ;;  %v1435_v38 = vor.u32 %v1625_v31, %v1432_v32  ;;  %v1376_v39 = vld [vmem:[#allocation7 + $0x1b0] sm:$0xf0]  ;;  %v1382_v40 = vld [vmem:[#allocation7 + $0x188] sm:$0xf]  ;;  %v1375_v44 = vor.u32 %v1618_v36, %v1374_v35 }
  0x1b   :  { %v1619_v41 = vld [vmem:[#allocation7 + $0x1b4] sm:$0xf0]  ;;  %v1613_v42 = vld [vmem:[#allocation7 + $0x18c] sm:$0xf]  ;;  %v1384_v43 = vld [vmem:[#allocation7 + $0x1b8] sm:$0xf0]  ;;  %v1379_v45 = vor.u32 %v1612_v37, %v1376_v39 }
  0x1c   :  { %688 = vmatpush.bf16.msra.mxu0 %v1423_v29  ;;  %v1383_v46 = vor.u32 %v1619_v41, %v1382_v40  ;;  %v1326_v47 = vld [vmem:[#allocation7 + $0x120] sm:$0xf]  ;;  %v1606_v48 = vld [vmem:[#allocation7 + $0x14c] sm:$0xf0]  ;;  %v1600_v49 = vld [vmem:[#allocation7 + $0x124] sm:$0xf]  ;;  %v1387_v50 = vor.u32 %v1613_v42, %v1384_v43 }
  0x1d   :  { %701 = vmatpush.bf16.msra.mxu1 %v1427_v33  ;;  %v1328_v51 = vld [vmem:[#allocation7 + $0x150] sm:$0xf0]  ;;  %v1334_v52 = vld [vmem:[#allocation7 + $0x128] sm:$0xf]  ;;  %v1607_v53 = vld [vmem:[#allocation7 + $0x154] sm:$0xf0]  ;;  %v1327_v56 = vor.u32 %v1606_v48, %v1326_v47 }
  0x1e   :  { %714 = vmatpush.bf16.msra.mxu2 %v1431_v34  ;;  %727 = vmatpush.bf16.msra.mxu3 %v1435_v38  ;;  %v1601_v54 = vld [vmem:[#allocation7 + $0x12c] sm:$0xf]  ;;  %v1336_v55 = vld [vmem:[#allocation7 + $0x158] sm:$0xf0]  ;;  %v1331_v57 = vor.u32 %v1600_v49, %v1328_v51  ;;  %v1335_v58 = vor.u32 %v1607_v53, %v1334_v52  ;;  %v1278_v59 = vld [vmem:[#allocation7 + $0xc0] sm:$0xf] }
  0x1f   :  { %v1594_v60 = vld [vmem:[#allocation7 + $0xec] sm:$0xf0]  ;;  %v1588_v61 = vld [vmem:[#allocation7 + $0xc4] sm:$0xf]  ;;  %v1339_v62 = vor.u32 %v1601_v54, %v1336_v55  ;;  %v1280_v63 = vld [vmem:[#allocation7 + $0xf0] sm:$0xf0] }
  0x20   :  { %689 = vmatpush.bf16.msra.mxu0 %v1375_v44  ;;  %v1286_v0 = vld [vmem:[#allocation7 + $0xc8] sm:$0xf]  ;;  %v1595_v1 = vld [vmem:[#allocation7 + $0xf4] sm:$0xf0]  ;;  %v1589_v2 = vld [vmem:[#allocation7 + $0xcc] sm:$0xf]  ;;  %v1279_v4 = vor.u32 %v1594_v60, %v1278_v59  ;;  %v1283_v5 = vor.u32 %v1588_v61, %v1280_v63 }
  0x21   :  { %702 = vmatpush.bf16.msra.mxu1 %v1379_v45  ;;  %v1288_v3 = vld [vmem:[#allocation7 + $0xf8] sm:$0xf0]  ;;  %v1287_v6 = vor.u32 %v1595_v1, %v1286_v0  ;;  %v1230_v7 = vld [vmem:[#allocation7 + $0x60] sm:$0xf]  ;;  %v1582_v8 = vld [vmem:[#allocation7 + $0x8c] sm:$0xf0] }
  0x22   :  { %715 = vmatpush.bf16.msra.mxu2 %v1383_v46  ;;  %728 = vmatpush.bf16.msra.mxu3 %v1387_v50  ;;  %v1576_v9 = vld [vmem:[#allocation7 + $0x64] sm:$0xf]  ;;  %v1291_v10 = vor.u32 %v1589_v2, %v1288_v3  ;;  %v1232_v11 = vld [vmem:[#allocation7 + $0x90] sm:$0xf0]  ;;  %v1238_v12 = vld [vmem:[#allocation7 + $0x68] sm:$0xf]  ;;  %v1231_v16 = vor.u32 %v1582_v8, %v1230_v7 }
  0x23   :  { %v1583_v13 = vld [vmem:[#allocation7 + $0x94] sm:$0xf0]  ;;  %v1577_v14 = vld [vmem:[#allocation7 + $0x6c] sm:$0xf]  ;;  %v1240_v15 = vld [vmem:[#allocation7 + $0x98] sm:$0xf0]  ;;  %v1235_v19 = vor.u32 %v1576_v9, %v1232_v11 }
  0x24   :  { %690 = vmatpush.bf16.msra.mxu0 %v1327_v56  ;;  %v1182_v17 = vld [vmem:[#allocation7] sm:$0xf]  ;;  %v1570_v18 = vld [vmem:[#allocation7 + $0x2c] sm:$0xf0]  ;;  %v1239_v20 = vor.u32 %v1583_v13, %v1238_v12  ;;  %v1564_v21 = vld [vmem:[#allocation7 + $0x4] sm:$0xf]  ;;  %v1243_v24 = vor.u32 %v1577_v14, %v1240_v15 }
  0x25   :  { %703 = vmatpush.bf16.msra.mxu1 %v1331_v57  ;;  %v1184_v22 = vld [vmem:[#allocation7 + $0x30] sm:$0xf0]  ;;  %v1190_v23 = vld [vmem:[#allocation7 + $0x8] sm:$0xf]  ;;  %v1571_v25 = vld [vmem:[#allocation7 + $0x34] sm:$0xf0]  ;;  %v1183_v31 = vor.u32 %v1570_v18, %v1182_v17 }
  0x26   :  { %716 = vmatpush.bf16.msra.mxu2 %v1335_v58  ;;  %729 = vmatpush.bf16.msra.mxu3 %v1339_v62  ;;  %v1565_v26 = vld [vmem:[#allocation7 + $0xc] sm:$0xf]  ;;  %v1192_v27 = vld [vmem:[#allocation7 + $0x38] sm:$0xf0]  ;;  %v1534_v28 = vld [vmem:[#allocation7 + $0x2b0] sm:$0xf]  ;;  %v1187_v35 = vor.u32 %v1564_v21, %v1184_v22  ;;  %v1191_v36 = vor.u32 %v1571_v25, %v1190_v23 }
  0x27   :  { %v1656_v29 = vld [vmem:[#allocation7 + $0x2dc] sm:$0xf0]  ;;  %v1650_v30 = vld [vmem:[#allocation7 + $0x2b4] sm:$0xf]  ;;  %v1536_v32 = vld [vmem:[#allocation7 + $0x2e0] sm:$0xf0]  ;;  %v1195_v39 = vor.u32 %v1565_v26, %v1192_v27 }
  0x28   :  { %691 = vmatpush.bf16.msra.mxu0 %v1279_v4  ;;  %v1542_v33 = vld [vmem:[#allocation7 + $0x2b8] sm:$0xf]  ;;  %v1657_v34 = vld [vmem:[#allocation7 + $0x2e4] sm:$0xf0]  ;;  %v1651_v37 = vld [vmem:[#allocation7 + $0x2bc] sm:$0xf]  ;;  %v1535_v40 = vor.u32 %v1656_v29, %v1534_v28  ;;  %v1539_v41 = vor.u32 %v1650_v30, %v1536_v32 }
  0x29   :  { %704 = vmatpush.bf16.msra.mxu1 %v1283_v5  ;;  %v1544_v38 = vld [vmem:[#allocation7 + $0x2e8] sm:$0xf0]  ;;  %v1543_v42 = vor.u32 %v1657_v34, %v1542_v33  ;;  %v1486_v43 = vld [vmem:[#allocation7 + $0x250] sm:$0xf]  ;;  %v1644_v44 = vld [vmem:[#allocation7 + $0x27c] sm:$0xf0] }
  0x2a   :  { %717 = vmatpush.bf16.msra.mxu2 %v1287_v6  ;;  %730 = vmatpush.bf16.msra.mxu3 %v1291_v10  ;;  %v1638_v45 = vld [vmem:[#allocation7 + $0x254] sm:$0xf]  ;;  %v1547_v46 = vor.u32 %v1651_v37, %v1544_v38  ;;  %v1488_v47 = vld [vmem:[#allocation7 + $0x280] sm:$0xf0]  ;;  %v1494_v48 = vld [vmem:[#allocation7 + $0x258] sm:$0xf]  ;;  %v1487_v53 = vor.u32 %v1644_v44, %v1486_v43 }
  0x2b   :  { %v1645_v49 = vld [vmem:[#allocation7 + $0x284] sm:$0xf0]  ;;  %v1639_v50 = vld [vmem:[#allocation7 + $0x25c] sm:$0xf]  ;;  %v1496_v51 = vld [vmem:[#allocation7 + $0x288] sm:$0xf0]  ;;  %v1491_v55 = vor.u32 %v1638_v45, %v1488_v47 }
  0x2c   :  { %692 = vmatpush.bf16.msra.mxu0 %v1231_v16  ;;  %v108_v52 = vld [vmem:[#allocation5] sm:$0xff]  ;;  %v1495_v56 = vor.u32 %v1645_v49, %v1494_v48  ;;  %v1438_v57 = vld [vmem:[#allocation7 + $0x1f0] sm:$0xf]  ;;  %v1632_v58 = vld [vmem:[#allocation7 + $0x21c] sm:$0xf0]  ;;  %v1499_v60 = vor.u32 %v1639_v50, %v1496_v51  ;;  %vm880_vm0 = vcmask 1040384  }
  0x2d   :  { %705 = vmatpush.bf16.msra.mxu1 %v1235_v19  ;;  %v1812_v54 = vpack.c.bf16 %v108_v52, %v108_v52  ;;  %v1626_v59 = vld [vmem:[#allocation7 + $0x1f4] sm:$0xf]  ;;  %v1440_v61 = vld [vmem:[#allocation7 + $0x220] sm:$0xf0]  ;;  %v1446_v62 = vld [vmem:[#allocation7 + $0x1f8] sm:$0xf]  ;;  %v1439_v2 = vor.u32 %v1632_v58, %v1438_v57 }
  0x2e   :  { %718 = vmatpush.bf16.msra.mxu2 %v1239_v20  ;;  %731 = vmatpush.bf16.msra.mxu3 %v1243_v24  ;;  %v1633_v63 = vld [vmem:[#allocation7 + $0x224] sm:$0xf0]  ;;  %v1627_v0 = vld [vmem:[#allocation7 + $0x1fc] sm:$0xf]  ;;  %v1448_v1 = vld [vmem:[#allocation7 + $0x228] sm:$0xf0]  ;;  %v1443_v3 = vor.u32 %v1626_v59, %v1440_v61 }
  0x2f   :  { %v1447_v4 = vor.u32 %v1633_v63, %v1446_v62  ;;  %v1390_v5 = vld [vmem:[#allocation7 + $0x190] sm:$0xf]  ;;  %v1620_v6 = vld [vmem:[#allocation7 + $0x1bc] sm:$0xf0]  ;;  %v1614_v7 = vld [vmem:[#allocation7 + $0x194] sm:$0xf]  ;;  %v1451_v8 = vor.u32 %v1627_v0, %v1448_v1 }
  0x30   :  { %693 = vmatpush.bf16.msra.mxu0 %v1183_v31  ;;  %v1392_v9 = vld [vmem:[#allocation7 + $0x1c0] sm:$0xf0]  ;;  %v1398_v10 = vld [vmem:[#allocation7 + $0x198] sm:$0xf]  ;;  %v1621_v11 = vld [vmem:[#allocation7 + $0x1c4] sm:$0xf0]  ;;  %v1391_v14 = vor.u32 %v1620_v6, %v1390_v5 }
  0x31   :  { %706 = vmatpush.bf16.msra.mxu1 %v1187_v35  ;;  %v1615_v12 = vld [vmem:[#allocation7 + $0x19c] sm:$0xf]  ;;  %v1400_v13 = vld [vmem:[#allocation7 + $0x1c8] sm:$0xf0]  ;;  %v1395_v15 = vor.u32 %v1614_v7, %v1392_v9  ;;  %v1399_v16 = vor.u32 %v1621_v11, %v1398_v10  ;;  %v1342_v17 = vld [vmem:[#allocation7 + $0x130] sm:$0xf] }
  0x32   :  { %719 = vmatpush.bf16.msra.mxu2 %v1191_v36  ;;  %732 = vmatpush.bf16.msra.mxu3 %v1195_v39  ;;  %v1608_v18 = vld [vmem:[#allocation7 + $0x15c] sm:$0xf0]  ;;  %v1602_v19 = vld [vmem:[#allocation7 + $0x134] sm:$0xf]  ;;  %v1403_v20 = vor.u32 %v1615_v12, %v1400_v13  ;;  %v1344_v21 = vld [vmem:[#allocation7 + $0x160] sm:$0xf0] }
  0x33   :  { %694 = vmatmul.bf16.vlgmr.msra.gmra.mxu0 %v1812_v54  ;;  %v1350_v22 = vld [vmem:[#allocation7 + $0x138] sm:$0xf]  ;;  %v1609_v23 = vld [vmem:[#allocation7 + $0x164] sm:$0xf0]  ;;  %v1603_v24 = vld [vmem:[#allocation7 + $0x13c] sm:$0xf]  ;;  %v1343_v26 = vor.u32 %v1608_v18, %v1342_v17  ;;  %v1347_v27 = vor.u32 %v1602_v19, %v1344_v21 }
  0x34   :  { %738 = vmatpush.bf16.msrb.mxu0 %v1535_v40  ;;  %707 = vmatmul.bf16.vlgmr.msra.gmra.mxu1 %v1812_v54  ;;  %v1352_v25 = vld [vmem:[#allocation7 + $0x168] sm:$0xf0]  ;;  %v1351_v28 = vor.u32 %v1609_v23, %v1350_v22  ;;  %v1294_v29 = vld [vmem:[#allocation7 + $0xd0] sm:$0xf]  ;;  %v1596_v30 = vld [vmem:[#allocation7 + $0xfc] sm:$0xf0] }
  0x35   :  { %751 = vmatpush.bf16.msrb.mxu1 %v1539_v41  ;;  %720 = vmatmul.bf16.vlgmr.msra.gmra.mxu2 %v1812_v54  ;;  %v1590_v31 = vld [vmem:[#allocation7 + $0xd4] sm:$0xf]  ;;  %v1355_v32 = vor.u32 %v1603_v24, %v1352_v25  ;;  %v1296_v33 = vld [vmem:[#allocation7 + $0x100] sm:$0xf0]  ;;  %v1302_v34 = vld [vmem:[#allocation7 + $0xd8] sm:$0xf]  ;;  %v1295_v38 = vor.u32 %v1596_v30, %v1294_v29 }
  0x36   :  { %764 = vmatpush.bf16.msrb.mxu2 %v1543_v42  ;;  %777 = vmatpush.bf16.msrb.mxu3 %v1547_v46  ;;  %v1597_v35 = vld [vmem:[#allocation7 + $0x104] sm:$0xf0]  ;;  %v1591_v36 = vld [vmem:[#allocation7 + $0xdc] sm:$0xf]  ;;  %v1304_v37 = vld [vmem:[#allocation7 + $0x108] sm:$0xf0]  ;;  %v1299_v39 = vor.u32 %v1590_v31, %v1296_v33 }
  0x37   :  { %733 = vmatmul.bf16.vlgmr.msra.gmra.mxu3 %v1812_v54  ;;  %v1303_v40 = vor.u32 %v1597_v35, %v1302_v34  ;;  %v1246_v41 = vld [vmem:[#allocation7 + $0x70] sm:$0xf]  ;;  %v1584_v42 = vld [vmem:[#allocation7 + $0x9c] sm:$0xf0]  ;;  %v1578_v43 = vld [vmem:[#allocation7 + $0x74] sm:$0xf]  ;;  %v1307_v44 = vor.u32 %v1591_v36, %v1304_v37 }
  0x38   :  { %739 = vmatpush.bf16.msrb.mxu0 %v1487_v53  ;;  %v1248_v45 = vld [vmem:[#allocation7 + $0xa0] sm:$0xf0]  ;;  %v1254_v46 = vld [vmem:[#allocation7 + $0x78] sm:$0xf]  ;;  %v1585_v47 = vld [vmem:[#allocation7 + $0xa4] sm:$0xf0]  ;;  %v1247_v50 = vor.u32 %v1584_v42, %v1246_v41 }
  0x39   :  { %752 = vmatpush.bf16.msrb.mxu1 %v1491_v55  ;;  %v1579_v48 = vld [vmem:[#allocation7 + $0x7c] sm:$0xf]  ;;  %v1256_v49 = vld [vmem:[#allocation7 + $0xa8] sm:$0xf0]  ;;  %v1198_v51 = vld [vmem:[#allocation7 + $0x10] sm:$0xf]  ;;  %v1251_v53 = vor.u32 %v1578_v43, %v1248_v45  ;;  %v1255_v55 = vor.u32 %v1585_v47, %v1254_v46 }
  0x3a   :  { %765 = vmatpush.bf16.msrb.mxu2 %v1495_v56  ;;  %778 = vmatpush.bf16.msrb.mxu3 %v1499_v60  ;;  %v1572_v52 = vld [vmem:[#allocation7 + $0x3c] sm:$0xf0]  ;;  %v1566_v56 = vld [vmem:[#allocation7 + $0x14] sm:$0xf]  ;;  %v1200_v57 = vld [vmem:[#allocation7 + $0x40] sm:$0xf0]  ;;  %v1259_v59 = vor.u32 %v1579_v48, %v1256_v49 }
  0x3b   :  { %v1206_v58 = vld [vmem:[#allocation7 + $0x18] sm:$0xf]  ;;  %v1573_v60 = vld [vmem:[#allocation7 + $0x44] sm:$0xf0]  ;;  %v1567_v61 = vld [vmem:[#allocation7 + $0x1c] sm:$0xf]  ;;  %v1203_v6 = vor.u32 %v1566_v56, %v1200_v57 }
  0x3c   :  { %740 = vmatpush.bf16.msrb.mxu0 %v1439_v2  ;;  %v1208_v62 = vld [vmem:[#allocation7 + $0x48] sm:$0xf0]  ;;  %v1550_v63 = vld [vmem:[#allocation7 + $0x2c0] sm:$0xf]  ;;  %v1658_v0 = vld [vmem:[#allocation7 + $0x2ec] sm:$0xf0]  ;;  %v1199_v2 = vor.u32 %v1572_v52, %v1198_v51  ;;  %v1207_v7 = vor.u32 %v1573_v60, %v1206_v58 }
  0x3d   :  { %753 = vmatpush.bf16.msrb.mxu1 %v1443_v3  ;;  %v1652_v1 = vld [vmem:[#allocation7 + $0x2c4] sm:$0xf]  ;;  %v1552_v3 = vld [vmem:[#allocation7 + $0x2f0] sm:$0xf0]  ;;  %v1659_v5 = vld [vmem:[#allocation7 + $0x2f4] sm:$0xf0]  ;;  %v1211_v10 = vor.u32 %v1567_v61, %v1208_v62  ;;  %v1551_v11 = vor.u32 %v1658_v0, %v1550_v63 }
  0x3e   :  { %766 = vmatpush.bf16.msrb.mxu2 %v1447_v4  ;;  %779 = vmatpush.bf16.msrb.mxu3 %v1451_v8  ;;  %v1558_v4 = vld [vmem:[#allocation7 + $0x2c8] sm:$0xf]  ;;  %v1653_v8 = vld [vmem:[#allocation7 + $0x2cc] sm:$0xf]  ;;  %v1560_v9 = vld [vmem:[#allocation7 + $0x2f8] sm:$0xf0]  ;;  %v1555_v12 = vor.u32 %v1652_v1, %v1552_v3 }
  0x3f   :  { %v1559_v13 = vor.u32 %v1659_v5, %v1558_v4  ;;  %v1563_v17 = vor.u32 %v1653_v8, %v1560_v9  ;;  %v1504_v18 = vld [vmem:[#allocation7 + $0x290] sm:$0xf0]  ;;  %v1510_v19 = vld [vmem:[#allocation7 + $0x268] sm:$0xf]  ;;  %v1641_v21 = vld [vmem:[#allocation7 + $0x26c] sm:$0xf] }
  0x40   :  { %741 = vmatpush.bf16.msrb.mxu0 %v1391_v14  ;;  %v1502_v14 = vld [vmem:[#allocation7 + $0x260] sm:$0xf]  ;;  %v1512_v22 = vld [vmem:[#allocation7 + $0x298] sm:$0xf0]  ;;  %v1456_v30 = vld [vmem:[#allocation7 + $0x230] sm:$0xf0] }
  0x41   :  { %754 = vmatpush.bf16.msrb.mxu1 %v1395_v15  ;;  %v1646_v15 = vld [vmem:[#allocation7 + $0x28c] sm:$0xf0]  ;;  %v1515_v29 = vor.u32 %v1641_v21, %v1512_v22  ;;  %v1462_v31 = vld [vmem:[#allocation7 + $0x208] sm:$0xf]  ;;  %v1629_v33 = vld [vmem:[#allocation7 + $0x20c] sm:$0xf] }
  0x42   :  { %767 = vmatpush.bf16.msrb.mxu2 %v1399_v16  ;;  %780 = vmatpush.bf16.msrb.mxu3 %v1403_v20  ;;  %v1640_v16 = vld [vmem:[#allocation7 + $0x264] sm:$0xf]  ;;  %v1647_v20 = vld [vmem:[#allocation7 + $0x294] sm:$0xf0]  ;;  %v1503_v23 = vor.u32 %v1646_v15, %v1502_v14  ;;  %v1464_v34 = vld [vmem:[#allocation7 + $0x238] sm:$0xf0] }
  0x43   :  { %v1507_v24 = vor.u32 %v1640_v16, %v1504_v18  ;;  %v1511_v25 = vor.u32 %v1647_v20, %v1510_v19  ;;  %v1467_v41 = vor.u32 %v1629_v33, %v1464_v34  ;;  %v1408_v42 = vld [vmem:[#allocation7 + $0x1d0] sm:$0xf0]  ;;  %v1414_v43 = vld [vmem:[#allocation7 + $0x1a8] sm:$0xf]  ;;  %v1617_v45 = vld [vmem:[#allocation7 + $0x1ac] sm:$0xf] }
  0x44   :  { %742 = vmatpush.bf16.msrb.mxu0 %v1343_v26  ;;  %v1454_v26 = vld [vmem:[#allocation7 + $0x200] sm:$0xf]  ;;  %v1416_v46 = vld [vmem:[#allocation7 + $0x1d8] sm:$0xf0]  ;;  %v1610_v51 = vld [vmem:[#allocation7 + $0x16c] sm:$0xf0] }
  0x45   :  { %755 = vmatpush.bf16.msrb.mxu1 %v1347_v27  ;;  %v1634_v27 = vld [vmem:[#allocation7 + $0x22c] sm:$0xf0]  ;;  %v1604_v52 = vld [vmem:[#allocation7 + $0x144] sm:$0xf]  ;;  %v1366_v56 = vld [vmem:[#allocation7 + $0x148] sm:$0xf] }
  0x46   :  { %768 = vmatpush.bf16.msrb.mxu2 %v1351_v28  ;;  %781 = vmatpush.bf16.msrb.mxu3 %v1355_v32  ;;  %v1628_v28 = vld [vmem:[#allocation7 + $0x204] sm:$0xf]  ;;  %v1635_v32 = vld [vmem:[#allocation7 + $0x234] sm:$0xf0]  ;;  %v1455_v35 = vor.u32 %v1634_v27, %v1454_v26  ;;  %v1605_v58 = vld [vmem:[#allocation7 + $0x14c] sm:$0xf] }
  0x47   :  { %v1459_v36 = vor.u32 %v1628_v28, %v1456_v30  ;;  %v1463_v37 = vor.u32 %v1635_v32, %v1462_v31  ;;  %v1611_v57 = vld [vmem:[#allocation7 + $0x174] sm:$0xf0]  ;;  %v1310_v63 = vld [vmem:[#allocation7 + $0xe0] sm:$0xf]  ;;  %v1598_v0 = vld [vmem:[#allocation7 + $0x10c] sm:$0xf0] }
  0x48   :  { %743 = vmatpush.bf16.msrb.mxu0 %v1295_v38  ;;  %v1406_v38 = vld [vmem:[#allocation7 + $0x1a0] sm:$0xf]  ;;  %v1367_v62 = vor.u32 %v1611_v57, %v1366_v56  ;;  %v1592_v1 = vld [vmem:[#allocation7 + $0xe4] sm:$0xf]  ;;  %v1312_v3 = vld [vmem:[#allocation7 + $0x110] sm:$0xf0]  ;;  %v1311_v8 = vor.u32 %v1598_v0, %v1310_v63 }
  0x49   :  { %756 = vmatpush.bf16.msrb.mxu1 %v1299_v39  ;;  %v1622_v39 = vld [vmem:[#allocation7 + $0x1cc] sm:$0xf0]  ;;  %v1318_v4 = vld [vmem:[#allocation7 + $0xe8] sm:$0xf]  ;;  %v1599_v5 = vld [vmem:[#allocation7 + $0x114] sm:$0xf0]  ;;  %v1315_v9 = vor.u32 %v1592_v1, %v1312_v3 }
  0x4a   :  { %769 = vmatpush.bf16.msrb.mxu2 %v1303_v40  ;;  %782 = vmatpush.bf16.msrb.mxu3 %v1307_v44  ;;  %v1616_v40 = vld [vmem:[#allocation7 + $0x1a4] sm:$0xf]  ;;  %v1623_v44 = vld [vmem:[#allocation7 + $0x1d4] sm:$0xf0]  ;;  %v1407_v47 = vor.u32 %v1622_v39, %v1406_v38  ;;  %v1264_v15 = vld [vmem:[#allocation7 + $0xb0] sm:$0xf0] }
  0x4b   :  { %v1411_v48 = vor.u32 %v1616_v40, %v1408_v42  ;;  %v1415_v49 = vor.u32 %v1623_v44, %v1414_v43  ;;  %v1270_v16 = vld [vmem:[#allocation7 + $0x88] sm:$0xf]  ;;  %v1581_v18 = vld [vmem:[#allocation7 + $0x8c] sm:$0xf]  ;;  %v1272_v19 = vld [vmem:[#allocation7 + $0xb8] sm:$0xf0] }
  0x4c   :  { %744 = vmatpush.bf16.msrb.mxu0 %v1247_v50  ;;  %v1358_v50 = vld [vmem:[#allocation7 + $0x140] sm:$0xf]  ;;  %v1275_v26 = vor.u32 %v1581_v18, %v1272_v19  ;;  %v1216_v27 = vld [vmem:[#allocation7 + $0x50] sm:$0xf0]  ;;  %v1222_v28 = vld [vmem:[#allocation7 + $0x28] sm:$0xf] }
  0x4d   :  { %757 = vmatpush.bf16.msrb.mxu1 %v1251_v53  ;;  %v1419_v53 = vor.u32 %v1617_v45, %v1416_v46  ;;  %v1359_v60 = vor.u32 %v1610_v51, %v1358_v50  ;;  %v1569_v30 = vld [vmem:[#allocation7 + $0x2c] sm:$0xf]  ;;  %v1224_v31 = vld [vmem:[#allocation7 + $0x58] sm:$0xf0]  ;;  %vm1940_vm1 = vcmask 1042434   ;;  %vm886_vm2 = vcmask 1044484  }
  0x4e   :  { %770 = vmatpush.bf16.msrb.mxu2 %v1255_v55  ;;  %783 = vmatpush.bf16.msrb.mxu3 %v1259_v59  ;;  %v1360_v55 = vld [vmem:[#allocation7 + $0x170] sm:$0xf0]  ;;  %v1368_v59 = vld [vmem:[#allocation7 + $0x178] sm:$0xf0]  ;;  %vm888_vm3 = vcmask 1046534   ;;  %vm897_vm4 = vcmask 1041409  }
  0x4f   :  { %v1363_v61 = vor.u32 %v1604_v52, %v1360_v55  ;;  %vm1941_vm5 = vcmask 1043459   ;;  %vm903_vm6 = vcmask 1045509   ;;  %vm905_vm7 = vcmask 1046528   ;;  %s1782_s1 = smov [#allocation8]   ;;  %s1165_s7 = sshll.u32 %s1939_s3, 4  ;;  %s1166_s7 = int_to_ptr.hbm [resolvable:$true] %s1165_s7 }
  0x50   :  { %745 = vmatpush.bf16.msrb.mxu0 %v1199_v2  ;;  %v1371_v2 = vor.u32 %v1605_v58, %v1368_v59  ;;  %vm1942_vm8 = vcmask 1041408   ;;  %vm890_vm9 = vcmask 1045508   ;;  %vm1943_vm10 = vcmask 1042433   ;;  %s1163_s2 = sshll.u32 %s1782_s1, 4  ;;  %s1164_s2 = int_to_ptr.vmem [resolvable:$true] %s1163_s2 }
  0x51   :  { %758 = vmatpush.bf16.msrb.mxu1 %v1203_v6  ;;  %v1593_v6 = vld [vmem:[#allocation7 + $0xec] sm:$0xf]  ;;  %vm1946_vm11 = vcmask 1046533   ;;  %vm1945_vm12 = vcmask 1043458   ;;  %vm1948_vm13 = vcmask 1045504   ;;  %vm1944_vm14 = vcmask 1044483  }
  0x52   :  { %771 = vmatpush.bf16.msrb.mxu2 %v1207_v7  ;;  %784 = vmatpush.bf16.msrb.mxu3 %v1211_v10  ;;  %v1320_v7 = vld [vmem:[#allocation7 + $0x118] sm:$0xf0]  ;;  %v1319_v10 = vor.u32 %v1599_v5, %v1318_v4  ;;  %vm1947_vm15 = vcmask 1046529  }
  0x53   :  { %746 = vmatmul.bf16.vlgmr.msrb.gmra.mxu0 %v1812_v54  ;;  %v1323_v14 = vor.u32 %v1593_v6, %v1320_v7 }
  0x54   :  { %790 = vmatpush.bf16.msra.mxu0 %v1551_v11  ;;  %759 = vmatmul.bf16.vlgmr.msrb.gmra.mxu1 %v1812_v54  ;;  %v1262_v11 = vld [vmem:[#allocation7 + $0x80] sm:$0xf] }
  0x55   :  { %803 = vmatpush.bf16.msra.mxu1 %v1555_v12  ;;  %772 = vmatmul.bf16.vlgmr.msrb.gmra.mxu2 %v1812_v54  ;;  %v1586_v12 = vld [vmem:[#allocation7 + $0xac] sm:$0xf0] }
  0x56   :  { %816 = vmatpush.bf16.msra.mxu2 %v1559_v13  ;;  %829 = vmatpush.bf16.msra.mxu3 %v1563_v17  ;;  %v1580_v13 = vld [vmem:[#allocation7 + $0x84] sm:$0xf]  ;;  %v1587_v17 = vld [vmem:[#allocation7 + $0xb4] sm:$0xf0]  ;;  %v1263_v20 = vor.u32 %v1586_v12, %v1262_v11 }
  0x57   :  { %785 = vmatmul.bf16.vlgmr.msrb.gmra.mxu3 %v1812_v54  ;;  %v1267_v21 = vor.u32 %v1580_v13, %v1264_v15  ;;  %v1271_v22 = vor.u32 %v1587_v17, %v1270_v16 }
  0x58   :  { %791 = vmatpush.bf16.msra.mxu0 %v1503_v23  ;;  %v1214_v23 = vld [vmem:[#allocation7 + $0x20] sm:$0xf] }
  0x59   :  { %804 = vmatpush.bf16.msra.mxu1 %v1507_v24  ;;  %v1574_v24 = vld [vmem:[#allocation7 + $0x4c] sm:$0xf0] }
  0x5a   :  { %817 = vmatpush.bf16.msra.mxu2 %v1511_v25  ;;  %830 = vmatpush.bf16.msra.mxu3 %v1515_v29  ;;  %v1568_v25 = vld [vmem:[#allocation7 + $0x24] sm:$0xf]  ;;  %v1575_v29 = vld [vmem:[#allocation7 + $0x54] sm:$0xf0]  ;;  %v1215_v32 = vor.u32 %v1574_v24, %v1214_v23 }
  0x5b   :  { %v1219_v33 = vor.u32 %v1568_v25, %v1216_v27  ;;  %v1223_v34 = vor.u32 %v1575_v29, %v1222_v28 }
  0x5c   :  { %792 = vmatpush.bf16.msra.mxu0 %v1455_v35  ;;  %v1227_v35 = vor.u32 %v1569_v30, %v1224_v31 }
  0x5d   :  { %805 = vmatpush.bf16.msra.mxu1 %v1459_v36 }
  0x5e   :  { %818 = vmatpush.bf16.msra.mxu2 %v1463_v37  ;;  %831 = vmatpush.bf16.msra.mxu3 %v1467_v41 }
  0x60   :  { %793 = vmatpush.bf16.msra.mxu0 %v1407_v47 }
  0x61   :  { %806 = vmatpush.bf16.msra.mxu1 %v1411_v48 }
  0x62   :  { %819 = vmatpush.bf16.msra.mxu2 %v1415_v49  ;;  %832 = vmatpush.bf16.msra.mxu3 %v1419_v53 }
  0x64   :  { %794 = vmatpush.bf16.msra.mxu0 %v1359_v60 }
  0x65   :  { %807 = vmatpush.bf16.msra.mxu1 %v1363_v61 }
  0x66   :  { %820 = vmatpush.bf16.msra.mxu2 %v1367_v62  ;;  %833 = vmatpush.bf16.msra.mxu3 %v1371_v2 }
  0x68   :  { %795 = vmatpush.bf16.msra.mxu0 %v1311_v8 }
  0x69   :  { %808 = vmatpush.bf16.msra.mxu1 %v1315_v9 }
  0x6a   :  { %821 = vmatpush.bf16.msra.mxu2 %v1319_v10  ;;  %834 = vmatpush.bf16.msra.mxu3 %v1323_v14 }
  0x6c   :  { %796 = vmatpush.bf16.msra.mxu0 %v1263_v20 }
  0x6d   :  { %809 = vmatpush.bf16.msra.mxu1 %v1267_v21 }
  0x6e   :  { %822 = vmatpush.bf16.msra.mxu2 %v1271_v22  ;;  %835 = vmatpush.bf16.msra.mxu3 %v1275_v26 }
  0x70   :  { %797 = vmatpush.bf16.msra.mxu0 %v1215_v32 }
  0x71   :  { %810 = vmatpush.bf16.msra.mxu1 %v1219_v33 }
  0x72   :  { %823 = vmatpush.bf16.msra.mxu2 %v1223_v34  ;;  %836 = vmatpush.bf16.msra.mxu3 %v1227_v35 }
  0x73   :  { %798 = vmatmul.bf16.vlgmr.msra.gmra.mxu0 %v1812_v54 }
  0x74   :  { %811 = vmatmul.bf16.vlgmr.msra.gmra.mxu1 %v1812_v54 }
  0x75   :  { %824 = vmatmul.bf16.vlgmr.msra.gmra.mxu2 %v1812_v54  ;;  %837 = vmatmul.bf16.vlgmr.msra.gmra.mxu3 %v1812_v54 }
  0xb0   :  { %v695_v36 = vpop.f32.mrf.mxu0 }
  0xb1   :  { %v708_v37 = vpop.f32.mrf.mxu1 }
  0xb2   :  { %v870_v44 = vrot.slane %v708_v37, 7 }
  0xb4   :  { %v881_v54 = vsel %vm880_vm0, %v695_v36, %v870_v44  ;;  %v898_v47 = vsel %vm897_vm4, %v695_v36, %v870_v44  ;;  %v916_v48 = vsel %vm1940_vm1, %v695_v36, %v870_v44  ;;  %v931_v49 = vsel %vm1941_vm5, %v695_v36, %v870_v44 }
  0xb5   :  { %v946_v50 = vsel %vm886_vm2, %v695_v36, %v870_v44  ;;  %v958_v51 = vsel %vm903_vm6, %v695_v36, %v870_v44  ;;  %v970_v52 = vsel %vm888_vm3, %v695_v36, %v870_v44  ;;  %v982_v53 = vsel %vm905_vm7, %v870_v44, %v695_v36 }
  0xb8   :  { %v721_v38 = vpop.f32.mrf.mxu2  ;;  %v697_v40 = vpop.f32.mrf.mxu0 }
  0xb9   :  { %v710_v41 = vpop.f32.mrf.mxu1  ;;  %v871_v45 = vrot.slane %v721_v38, 6 }
  0xba   :  { %v734_v39 = vpop.f32.mrf.mxu3  ;;  %v842_v41 = vld [vmem:[#allocation2] sm:$0xff] }
  0xbb   :  { %v872_v46 = vrot.slane %v734_v39, 5 }
  0xbd   :  { %v883_v55 = vsel %vm1940_vm1, %v871_v45, %v872_v46  ;;  %v900_v56 = vsel %vm1941_vm5, %v871_v45, %v872_v46  ;;  %v917_v58 = vsel %vm886_vm2, %v871_v45, %v872_v46  ;;  %v932_v59 = vsel %vm903_vm6, %v871_v45, %v872_v46 }
  0xbe   :  { %v947_v60 = vsel %vm888_vm3, %v871_v45, %v872_v46  ;;  %v959_v61 = vsel %vm905_vm7, %v872_v46, %v871_v45  ;;  %v971_v63 = vsel %vm880_vm0, %v871_v45, %v872_v46  ;;  %v983_v0 = vsel %vm897_vm4, %v871_v45, %v872_v46 }
  0xbf   :  { %v885_v3 = vsel %vm1942_vm8, %v881_v54, %v883_v55  ;;  %vm892_vm1 = vcmask 1043456   ;;  %v902_v4 = vsel %vm1943_vm10, %v898_v47, %v900_v56  ;;  %v919_v5 = vsel %vm1945_vm12, %v916_v48, %v917_v58  ;;  %v844_v54 = vld [vmem:[#allocation2 + $0xc] sm:$0xff]  ;;  %v846_v47 = vld [vmem:[#allocation2 + $0x18] sm:$0xff]  ;;  %v848_v48 = vld [vmem:[#allocation2 + $0x24] sm:$0xff] }
  0xc0   :  { %v723_v42 = vpop.f32.mrf.mxu2  ;;  %v934_v6 = vsel %vm1944_vm14, %v931_v49, %v932_v59  ;;  %v948_v7 = vsel %vm890_vm9, %v946_v50, %v947_v60  ;;  %v960_v8 = vsel %vm1946_vm11, %v958_v51, %v959_v61  ;;  %v972_v9 = vsel %vm1948_vm13, %v971_v63, %v970_v52  ;;  %v850_v55 = vld [vmem:[#allocation2 + $0x30] sm:$0xff]  ;;  %v852_v60 = vld [vmem:[#allocation2 + $0x3c] sm:$0xff] }
  0xc1   :  { %v984_v10 = vsel %vm1947_vm15, %v983_v0, %v982_v53  ;;  %vm909_vm5 = vcmask 1044481   ;;  %vm924_vm8 = vcmask 1045506   ;;  %vm939_vm10 = vcmask 1046531   ;;  %v854_v0 = vld [vmem:[#allocation2 + $0x48] sm:$0xff] }
  0xc2   :  { %v736_v43 = vpop.f32.mrf.mxu3  ;;  %vm1949_vm14 = vcmask 1042434   ;;  %vm1950_vm12 = vcmask 1043459  }
  0xd0   :  { %v747_v57 = vpop.f32.mrf.mxu0 }
  0xd1   :  { %v760_v62 = vpop.f32.mrf.mxu1  ;;  %v873_v1 = vrot.slane %v747_v57, 4 }
  0xd2   :  { %v874_v2 = vrot.slane %v760_v62, 3 }
  0xd4   :  { %v887_v12 = vsel %vm886_vm2, %v873_v1, %v874_v2  ;;  %v904_v15 = vsel %vm903_vm6, %v873_v1, %v874_v2  ;;  %v920_v16 = vsel %vm888_vm3, %v873_v1, %v874_v2  ;;  %v935_v17 = vsel %vm905_vm7, %v874_v2, %v873_v1 }
  0xd5   :  { %v949_v19 = vsel %vm880_vm0, %v873_v1, %v874_v2  ;;  %v961_v20 = vsel %vm897_vm4, %v873_v1, %v874_v2  ;;  %v973_v21 = vsel %vm1949_vm14, %v873_v1, %v874_v2  ;;  %v985_v22 = vsel %vm1950_vm12, %v873_v1, %v874_v2  ;;  %vm1951_vm12 = vmmov %vm1949_vm14 }
  0xd6   :  { %vm1952_vm14 = vcmask 1041408  }
  0xd8   :  { %v773_v11 = vpop.f32.mrf.mxu2  ;;  %v749_v23 = vpop.f32.mrf.mxu0 }
  0xd9   :  { %v875_v13 = vrot.slane %v773_v11, 2  ;;  %v762_v28 = vpop.f32.mrf.mxu1 }
  0xda   :  { %v786_v14 = vpop.f32.mrf.mxu3 }
  0xdb   :  { %v876_v18 = vrot.slane %v786_v14, 1 }
  0xdd   :  { %v889_v24 = vsel %vm888_vm3, %v875_v13, %v876_v18  ;;  %v906_v25 = vsel %vm905_vm7, %v876_v18, %v875_v13  ;;  %v921_v26 = vsel %vm880_vm0, %v875_v13, %v876_v18  ;;  %v936_v27 = vsel %vm897_vm4, %v875_v13, %v876_v18 }
  0xde   :  { %v891_v29 = vsel %vm890_vm9, %v887_v12, %v889_v24  ;;  %v908_v30 = vsel %vm1946_vm11, %v904_v15, %v906_v25  ;;  %v923_v31 = vsel %vm1948_vm13, %v921_v26, %v920_v16  ;;  %v938_v32 = vsel %vm1947_vm15, %v936_v27, %v935_v17 }
  0xdf   :  { %v893_v33 = vsel %vm892_vm1, %v885_v3, %v891_v29  ;;  %v910_v34 = vsel %vm909_vm5, %v902_v4, %v908_v30  ;;  %v925_v35 = vsel %vm924_vm8, %v919_v5, %v923_v31  ;;  %v940_v36 = vsel %vm939_vm10, %v934_v6, %v938_v32  ;;  %v856_v5 = vld [vmem:[#allocation2 + $0x54] sm:$0xff] }
  0xe0   :  { %v911_v37 = vrot.slane %v910_v34, 1  ;;  %v926_v38 = vrot.slane %v925_v35, 2  ;;  %v941_v39 = vrot.slane %v940_v36, 3  ;;  %v950_v40 = vsel %vm1951_vm12, %v875_v13, %v876_v18  ;;  %v775_v46 = vpop.f32.mrf.mxu2 }
  0xe1   :  { %v951_v42 = vsel %vm1952_vm14, %v949_v19, %v950_v40  ;;  %vm1953_vm11 = vcmask 1043459   ;;  %v974_v44 = vsel %vm886_vm2, %v875_v13, %v876_v18  ;;  %v986_v45 = vsel %vm903_vm6, %v875_v13, %v876_v18 }
  0xe2   :  { %v962_v43 = vsel %vm1953_vm11, %v875_v13, %v876_v18  ;;  %v952_v49 = vsel %vm892_vm1, %v951_v42, %v948_v7  ;;  %vm1954_vm15 = vcmask 1042433   ;;  %vm1955_vm13 = vcmask 1043458   ;;  %v788_v53 = vpop.f32.mrf.mxu3 }
  0xe3   :  { %v963_v50 = vsel %vm1954_vm15, %v961_v20, %v962_v43  ;;  %v975_v51 = vsel %vm1955_vm13, %v973_v21, %v974_v44  ;;  %vm1956_vm12 = vcmask 1044483   ;;  %v953_v56 = vrot.slane %v952_v49, 4  ;;  %vm1961_vm13 = vmmov %vm1952_vm14  ;;  %v845_v53 = vld [vmem:[#allocation2 + $0x14] sm:$0xf] }
  0xe4   :  { %v987_v52 = vsel %vm1956_vm12, %v985_v22, %v986_v45  ;;  %v964_v57 = vsel %vm909_vm5, %v963_v50, %v960_v8  ;;  %v976_v58 = vsel %vm924_vm8, %v975_v51, %v972_v9  ;;  %v1010_v63 = vmul.f32 %v893_v33, %v842_v41  ;;  %vm1958_vm8 = vmmov %vm1953_vm11 }
  0xe5   :  { %v988_v59 = vsel %vm939_vm10, %v987_v52, %v984_v10  ;;  %v965_v61 = vrot.slane %v964_v57, 5  ;;  %v977_v62 = vrot.slane %v976_v58, 6  ;;  %v1012_v2 = vmul.f32 %v911_v37, %v844_v54  ;;  %vm1960_vm11 = vmmov %vm1958_vm8 }
  0xe6   :  { %v989_v1 = vrot.slane %v988_v59, 7  ;;  %v1014_v3 = vmul.f32 %v926_v38, %v846_v47  ;;  %v1016_v4 = vmul.f32 %v941_v39, %v848_v48  ;;  %v1018_v6 = vmul.f32 %v953_v56, %v850_v55  ;;  %1051 = vst [vmem:[#allocation1] ss:$9 sm:$0xff] %v1010_v63  ;;  %v843_v48 = vld [vmem:[#allocation2 + $0x8] sm:$0xf] }
  0xe7   :  { %v1020_v7 = vmul.f32 %v965_v61, %v852_v60  ;;  %1053 = vst [vmem:[#allocation1 + $0x1] ss:$9 sm:$0xff] %v1012_v2  ;;  %v1022_v11 = vmul.f32 %v977_v62, %v854_v0  ;;  %v1029_v9 = vlaneseq  ;;  %vm1957_vm5 = vcmask 1042434   ;;  %v847_v59 = vld [vmem:[#allocation2 + $0x20] sm:$0xf] }
  0xe8   :  { %1055 = vst [vmem:[#allocation1 + $0x2] ss:$9 sm:$0xff] %v1014_v3  ;;  %v1024_v8 = vmul.f32 %v989_v1, %v856_v5  ;;  %vm1959_vm10 = vmmov %vm1957_vm5  ;;  %vm1962_vm14 = vcmask 1043458   ;;  %v849_v60 = vld [vmem:[#allocation2 + $0x2c] sm:$0xf] }
  0xe9   :  { %1057 = vst [vmem:[#allocation1 + $0x3] ss:$9 sm:$0xff] %v1016_v4  ;;  %v1882_v10 = vshrl.u32 %v1029_v9, 7  ;;  %v851_v1 = vld [vmem:[#allocation2 + $0x38] sm:$0xf] }
  0xea   :  { %1059 = vst [vmem:[#allocation1 + $0x4] ss:$9 sm:$0xff] %v1018_v6 }
  0xeb   :  { %1061 = vst [vmem:[#allocation1 + $0x5] ss:$9 sm:$0xff] %v1020_v7  ;;  %vm1032_vm1 = vcmp.lt.s32.totalorder %v1882_v10, 1  ;;  %v853_v7 = vld [vmem:[#allocation2 + $0x44] sm:$0xf] }
  0xec   :  { %1063 = vst [vmem:[#allocation1 + $0x6] ss:$9 sm:$0xff] %v1022_v11 }
  0xed   :  { %1065 = vst [vmem:[#allocation1 + $0x7] ss:$9 sm:$0xff] %v1024_v8 }
  0xf0   :  { %v799_v12 = vpop.f32.mrf.mxu0 }
  0xf1   :  { %v812_v13 = vpop.f32.mrf.mxu1 }
  0xf2   :  { %v877_v14 = vrot.slane %v812_v13, 7  ;;  %v855_v13 = vld [vmem:[#allocation2 + $0x50] sm:$0xf] }
  0xf4   :  { %v1066_v15 = vld [vmem:[#allocation1] sm:$0xff]  ;;  %v1067_v16 = vld [vmem:[#allocation1 + $0x9] sm:$0xff]  ;;  %v1068_v17 = vld [vmem:[#allocation1 + $0x12] sm:$0xff]  ;;  %v894_v18 = vsel %vm880_vm0, %v799_v12, %v877_v14  ;;  %v912_v19 = vsel %vm897_vm4, %v799_v12, %v877_v14  ;;  %v927_v23 = vsel %vm1957_vm5, %v799_v12, %v877_v14  ;;  %v942_v24 = vsel %vm1958_vm8, %v799_v12, %v877_v14 }
  0xf5   :  { %v1069_v20 = vld [vmem:[#allocation1 + $0x1b] sm:$0xff]  ;;  %v1070_v21 = vld [vmem:[#allocation1 + $0x24] sm:$0xff]  ;;  %v1071_v22 = vld [vmem:[#allocation1 + $0x2d] sm:$0xff]  ;;  %v954_v25 = vsel %vm886_vm2, %v799_v12, %v877_v14  ;;  %v966_v26 = vsel %vm903_vm6, %v799_v12, %v877_v14  ;;  %v1098_v29 = vsel %vm1032_vm1, %v1066_v15, 0.0  ;;  %v1099_v30 = vsel %vm1032_vm1, %v1067_v16, 0.0 }
  0xf6   :  { %v1072_v27 = vld [vmem:[#allocation1 + $0x36] sm:$0xff]  ;;  %v1073_v28 = vld [vmem:[#allocation1 + $0x3f] sm:$0xff]  ;;  %v1100_v31 = vsel %vm1032_vm1, %v1068_v17, 0.0  ;;  %v1101_v32 = vsel %vm1032_vm1, %v1069_v20, 0.0  ;;  %v1102_v34 = vsel %vm1032_vm1, %v1070_v21, 0.0  ;;  %v1103_v35 = vsel %vm1032_vm1, %v1071_v22, 0.0 }
  0xf7   :  { %v1104_v36 = vsel %vm1032_vm1, %v1072_v27, 0.0  ;;  %v1105_v37 = vsel %vm1032_vm1, %v1073_v28, 0.0  ;;  %v978_v41 = vsel %vm888_vm3, %v799_v12, %v877_v14  ;;  %v990_v42 = vsel %vm905_vm7, %v877_v14, %v799_v12  ;;  %1146 = vst [vmem:[#allocation8] sm:$0xff] %v1098_v29 }
  0xf8   :  { %v825_v33 = vpop.f32.mrf.mxu2  ;;  %v838_v39 = vpop.f32.mrf.mxu3  ;;  %1147 = vst [vmem:[#allocation8 + $0x8] sm:$0xff] %v1099_v30  ;;  %vm1965_vm5 = vcmask 1046529  }
  0xf9   :  { %v878_v38 = vrot.slane %v825_v33, 6  ;;  %v801_v40 = vpop.f32.mrf.mxu0  ;;  %v879_v43 = vrot.slane %v838_v39, 5  ;;  %v814_v44 = vpop.f32.mrf.mxu1  ;;  %1148 = vst [vmem:[#allocation8 + $0x10] sm:$0xff] %v1100_v31 }
  0xfa   :  { %1149 = vst [vmem:[#allocation8 + $0x18] sm:$0xff] %v1101_v32 }
  0xfb   :  { %v895_v45 = vsel %vm1959_vm10, %v878_v38, %v879_v43  ;;  %v913_v46 = vsel %vm1960_vm11, %v878_v38, %v879_v43  ;;  %v928_v54 = vsel %vm886_vm2, %v878_v38, %v879_v43  ;;  %v943_v47 = vsel %vm903_vm6, %v878_v38, %v879_v43  ;;  %1150 = vst [vmem:[#allocation8 + $0x20] sm:$0xff] %v1102_v34 }
  0xfc   :  { %v896_v49 = vsel %vm1961_vm13, %v894_v18, %v895_v45  ;;  %v914_v50 = vsel %vm1954_vm15, %v912_v19, %v913_v46  ;;  %v929_v51 = vsel %vm1962_vm14, %v927_v23, %v928_v54  ;;  %v944_v52 = vsel %vm1956_vm12, %v942_v24, %v943_v47  ;;  %1151 = vst [vmem:[#allocation8 + $0x28] sm:$0xff] %v1103_v35  ;;  %v857_v18 = vld [vmem:[#allocation2 + $0x5c] sm:$0xf] }
  0xfd   :  { %v915_v55 = vrot.slane %v914_v50, 1  ;;  %v930_v56 = vrot.slane %v929_v51, 2  ;;  %v945_v57 = vrot.slane %v944_v52, 3  ;;  %v955_v58 = vsel %vm888_vm3, %v878_v38, %v879_v43  ;;  %1152 = vst [vmem:[#allocation8 + $0x30] sm:$0xff] %v1104_v36 }
  0xfe   :  { %v956_v61 = vsel %vm890_vm9, %v954_v25, %v955_v58  ;;  %v967_v62 = vsel %vm905_vm7, %v879_v43, %v878_v38  ;;  %v979_v63 = vsel %vm880_vm0, %v878_v38, %v879_v43  ;;  %v991_v0 = vsel %vm897_vm4, %v878_v38, %v879_v43  ;;  %1153 = vst [vmem:[#allocation8 + $0x38] sm:$0xff] %v1105_v37 }
  0xff   :  { %v957_v2 = vrot.slane %v956_v61, 4  ;;  %vm1963_vm2 = vcmask 1046533   ;;  %vm1964_vm6 = vcmask 1045504   ;;  %v992_v5 = vsel %vm1965_vm5, %v991_v0, %v990_v42 }
 0x100   :  { %v968_v3 = vsel %vm1963_vm2, %v966_v26, %v967_v62  ;;  %v980_v4 = vsel %vm1964_vm6, %v979_v63, %v978_v41  ;;  %v827_v6 = vpop.f32.mrf.mxu2  ;;  %v1011_v9 = vmul.f32 %v896_v49, %v843_v48  ;;  %v840_v12 = vpop.f32.mrf.mxu3  ;;  %v993_v14 = vrot.slane %v992_v5, 7 }
 0x101   :  { %v969_v11 = vrot.slane %v968_v3, 5  ;;  %v981_v8 = vrot.slane %v980_v4, 6  ;;  %v1013_v15 = vmul.f32 %v915_v55, %v845_v53  ;;  %v1015_v16 = vmul.f32 %v930_v56, %v847_v59 }
 0x102   :  { %v1017_v17 = vmul.f32 %v945_v57, %v849_v60  ;;  %v1019_v19 = vmul.f32 %v957_v2, %v851_v1  ;;  %1074 = vst [vmem:[#allocation1] ss:$9 sm:$0xff] %v1011_v9  ;;  %v1025_v22 = vmul.f32 %v993_v14, %v857_v18 }
 0x103   :  { %v1021_v20 = vmul.f32 %v969_v11, %v853_v7  ;;  %1075 = vst [vmem:[#allocation1 + $0x1] ss:$9 sm:$0xff] %v1013_v15  ;;  %v1023_v21 = vmul.f32 %v981_v8, %v855_v13 }
 0x104   :  { %1076 = vst [vmem:[#allocation1 + $0x2] ss:$9 sm:$0xff] %v1015_v16 }
 0x105   :  { %1077 = vst [vmem:[#allocation1 + $0x3] ss:$9 sm:$0xff] %v1017_v17 }
 0x106   :  { %1078 = vst [vmem:[#allocation1 + $0x4] ss:$9 sm:$0xff] %v1019_v19 }
 0x107   :  { %1079 = vst [vmem:[#allocation1 + $0x5] ss:$9 sm:$0xff] %v1021_v20 }
 0x108   :  { %1080 = vst [vmem:[#allocation1 + $0x6] ss:$9 sm:$0xff] %v1023_v21 }
 0x109   :  { %1081 = vst [vmem:[#allocation1 + $0x7] ss:$9 sm:$0xff] %v1025_v22 }
 0x110   :  { %v1082_v23 = vld [vmem:[#allocation1] sm:$0xff]  ;;  %v1083_v24 = vld [vmem:[#allocation1 + $0x9] sm:$0xff]  ;;  %v1084_v25 = vld [vmem:[#allocation1 + $0x12] sm:$0xff] }
 0x111   :  { %v1085_v26 = vld [vmem:[#allocation1 + $0x1b] sm:$0xff]  ;;  %v1106_v27 = vsel %vm1032_vm1, %v1082_v23, 0.0  ;;  %v1107_v28 = vsel %vm1032_vm1, %v1083_v24, 0.0  ;;  %v1108_v29 = vsel %vm1032_vm1, %v1084_v25, 0.0 }
 0x112   :  { %v1109_v30 = vsel %vm1032_vm1, %v1085_v26, 0.0  ;;  %1154 = vst [vmem:[#allocation8 + $0x40] sm:$0xff] %v1106_v27 }
 0x113   :  { %1155 = vst [vmem:[#allocation8 + $0x48] sm:$0xff] %v1107_v28 }
 0x114   :  { %1156 = vst [vmem:[#allocation8 + $0x50] sm:$0xff] %v1108_v29 }
 0x115   :  { %1157 = vst [vmem:[#allocation8 + $0x58] sm:$0xff] %v1109_v30 }
 0x116   :  { %1168 = dma.vmem_to_hbm [thread:$0]  %s1164_s2, 1536, %s1166_s7, [#allocation4]  }
 0x117   :  { %1771 = dma.done.wait [#allocation4], 1536  }
 0x118   :  { %1772 = vsyncadd [#allocation4], 4294965760 }
 0x119   :  { %1173 = vsyncpa [#allocation3], 1 }
 0x11a   :  { %1174 = vsyncpa [#allocation6], 1 }
 0x11b   :  { %1175 = vsyncpa [#allocation4], 1 }

</bundles_post_ra>
